<compile_context>
chip_gen: v6e
topology: v6e:2x2x1
jax: 0.10.0
libtpu: 0.0.40
codegen_flags: <defaults>
</compile_context>

<pallas_src>
import jax
import jax.numpy as jnp
from jax.experimental import pallas as pl
from jax.experimental.pallas import tpu as pltpu


def _round_up(a: int, b: int) -> int:
    return ((a + b - 1) // b) * b


def _make_tv_kernel(h, w, lane, chunk, n_full, rem):
    hw = h * w

    def chunk_sums(x_ref, start, size):
        # (size, lane) chunk of flattened image slices; accumulate in f32.
        xs = x_ref[pl.ds(start, size), :].astype(jnp.float32)
        # Vertical neighbour lives +w lanes away, horizontal neighbour +1 lane.
        dv = pltpu.roll(xs, lane - w, axis=1) - xs
        dw = pltpu.roll(xs, lane - 1, axis=1) - xs
        # Reduce only the (untiled) slice axis; edge masking is deferred to the
        # per-block epilogue because it only depends on the lane position.
        return (jnp.sum(dv * dv, axis=0, keepdims=True),
                jnp.sum(dw * dw, axis=0, keepdims=True))

    def kernel(x_ref, h_ref, w_ref):
        def body(i, carry):
            h_acc, w_acc = carry
            start = pl.multiple_of(i * chunk, chunk)
            hs, ws = chunk_sums(x_ref, start, chunk)
            return h_acc + hs, w_acc + ws

        init = (jnp.zeros((1, lane), jnp.float32),
                jnp.zeros((1, lane), jnp.float32))
        h_acc, w_acc = jax.lax.fori_loop(0, n_full, body, init)
        if rem:  # static tail (block size not an exact multiple of `chunk`)
            hs, ws = chunk_sums(x_ref, n_full * chunk, rem)
            h_acc, w_acc = h_acc + hs, w_acc + ws

        # Lane-position masks: drop wrap-around, image-seam and padding terms.
        pos = jax.lax.broadcasted_iota(jnp.int32, (1, lane), 1)
        h_valid = pos < (h - 1) * w                                 # vertical pairs
        w_valid = jnp.logical_and(pos % w != (w - 1), pos < hw)     # horizontal pairs
        h_sum = jnp.sum(jnp.where(h_valid, h_acc, 0.0))
        w_sum = jnp.sum(jnp.where(w_valid, w_acc, 0.0))

        h_ref[...] = jnp.full(h_ref.shape, h_sum, dtype=jnp.float32)
        w_ref[...] = jnp.full(w_ref.shape, w_sum, dtype=jnp.float32)

    return kernel


def tv_loss(x, tv_loss_weight=1.0):
    """Total-variation loss with the same semantics as the PyTorch TVLoss module."""
    n, c, h, w = x.shape
    nc = n * c
    hw = h * w
    itemsize = x.dtype.itemsize

    # ---- generation-aware VMEM budget -------------------------------------
    try:
        vmem_cap = int(getattr(pltpu.get_tpu_info(), "vmem_capacity_bytes", 64 << 20))
    except Exception:
        vmem_cap = 64 << 20                       # v7x-safe fallback
    vmem_limit = max(16 << 20, vmem_cap // 2)     # ~32 MiB on v7x, ~64 MiB on v5e/v6e
    block_target = vmem_limit // 4                # HBM bytes DMA'd per grid step

    # ---- lane-dense layout: one image slice per row, spatial dims in lanes --
    lane = _round_up(hw, 128)
    row_bytes = lane * itemsize

    # ---- slices per block: multiple of 8 (aligned sublane tiles), big enough
    # ---- to amortize the ~0.35us per-step pipeline overhead ------------------
    nc8 = _round_up(nc, 8)
    blk = max(8, min(nc8, (block_target // row_bytes) // 8 * 8))
    if blk >= nc8 and nc8 >= 16:                  # keep both v7x TensorCores busy
        blk = _round_up(nc8 // 2, 8)
    num_blocks = pl.cdiv(nc, blk)
    nc_pad = num_blocks * blk

    # ---- in-kernel chunking: keep f32 intermediates to a few MiB ------------
    chunk = max(8, ((2 << 20) // (lane * 4)) // 8 * 8)
    chunk = min(chunk, blk)
    n_full, rem = blk // chunk, blk % chunk

    # Raise the scoped-VMEM limit for the rare huge-image case that needs it.
    needed = 2 * blk * row_bytes + 4 * chunk * lane * 4 + 4 * lane * 4 + (2 << 20)
    vmem_limit = min(max(vmem_limit, needed), (vmem_cap * 7) // 8)
    # TODO(synk): for images so large that even an 8-slice chunk overflows the
    # v7x 64 MiB VMEM, additionally split each slice along H with a 1-row halo.

    x2 = x.reshape(nc, hw)
    if nc_pad != nc or lane != hw:
        # Zero padding contributes exactly 0 to both sums (padding lanes are
        # also masked in-kernel); the copy only triggers for awkward shapes.
        x2 = jnp.pad(x2, ((0, nc_pad - nc), (0, lane - hw)))

    kernel = _make_tv_kernel(h, w, lane, chunk, n_full, rem)
    h_part, w_part = pl.pallas_call(
        kernel,
        out_shape=(
            jax.ShapeDtypeStruct((num_blocks, 1, 128), jnp.float32),
            jax.ShapeDtypeStruct((num_blocks, 1, 128), jnp.float32),
        ),
        grid_spec=pltpu.PrefetchScalarGridSpec(
            num_scalar_prefetch=0,
            grid=(num_blocks,),
            in_specs=[pl.BlockSpec((blk, lane), lambda i: (i, 0))],
            out_specs=(
                pl.BlockSpec((1, 1, 128), lambda i: (i, 0, 0)),
                pl.BlockSpec((1, 1, 128), lambda i: (i, 0, 0)),
            ),
        ),
        compiler_params=pltpu.CompilerParams(
            dimension_semantics=("parallel",),    # independent per-block partials
            vmem_limit_bytes=int(vmem_limit),
        ),
    )(x2)

    h_tv = jnp.sum(h_part[:, 0, 0])
    w_tv = jnp.sum(w_part[:, 0, 0])
    # NOTE: h == 1 or w == 1 gives a zero count -> inf/nan, exactly like the
    # reference PyTorch module.
    count_h = c * (h - 1) * w
    count_w = c * h * (w - 1)
    return tv_loss_weight * 2.0 * (h_tv / count_h + w_tv / count_w) / n


if __name__ == "__main__":
    key = jax.random.PRNGKey(0)
    x = jax.random.normal(key, (2, 4, 16, 16), dtype=jnp.float32)

    out = jax.block_until_ready(tv_loss(x, tv_loss_weight=1.0))

    # Pure-JAX reference (same math as the PyTorch module).
    n, c, h, w = x.shape
    ref_h = jnp.sum((x[:, :, 1:, :] - x[:, :, :-1, :]) ** 2)
    ref_w = jnp.sum((x[:, :, :, 1:] - x[:, :, :, :-1]) ** 2)
    ref = 2.0 * (ref_h / (c * (h - 1) * w) + ref_w / (c * h * (w - 1))) / n
    assert jnp.allclose(out, ref, rtol=1e-5, atol=1e-5), (out, ref)

    print("KERNEL_OK")
</pallas_src>

<mosaic_0001>
module attributes {stable_mosaic.version = 11 : i64} {
  func.func @kernel(%arg0: i32, %arg1: memref<8x256xf32, #tpu.memory_space<vmem>>, %arg2: memref<1x1x128xf32, #tpu.memory_space<vmem>>, %arg3: memref<1x1x128xf32, #tpu.memory_space<vmem>>) attributes {dimension_semantics = [#tpu.dimension_semantics<parallel>], iteration_bounds = array<i64: 1>, scalar_prefetch = 0 : i64, scratch_operands = 0 : i64, tpu.core_type = #tpu.core_type<tc>, window_params = [{transform_indices = @transform_0, window_bounds = array<i64: 8, 256>}, {transform_indices = @transform_1, window_bounds = array<i64: 1, 1, 128>}, {transform_indices = @transform_2, window_bounds = array<i64: 1, 1, 128>}]} {
    %cst = arith.constant 0.000000e+00 : f32
    %0 = vector.broadcast %cst : f32 to vector<1x256xf32>
    %cst_0 = arith.constant 0.000000e+00 : f32
    %1 = vector.broadcast %cst_0 : f32 to vector<1x256xf32>
    %c0_i32 = arith.constant 0 : i32
    %c8_i32 = arith.constant 8 : i32
    %2 = arith.muli %c0_i32, %c8_i32 : i32
    %3 = tpu.assume_multiple %2, 8 : i32
    %4 = arith.index_cast %3 : i32 to index
    %c0 = arith.constant 0 : index
    %5 = vector.load %arg1[%4, %c0] : memref<8x256xf32, #tpu.memory_space<vmem>>, vector<8x256xf32>
    %c240_i32 = arith.constant 240 : i32
    %6 = tpu.dynamic_rotate %5 by %c240_i32 dim 1 : vector<8x256xf32>, i32 -> vector<8x256xf32>
    %7 = arith.subf %6, %5 : vector<8x256xf32>
    %c255_i32 = arith.constant 255 : i32
    %8 = tpu.dynamic_rotate %5 by %c255_i32 dim 1 : vector<8x256xf32>, i32 -> vector<8x256xf32>
    %9 = arith.subf %8, %5 : vector<8x256xf32>
    %10 = arith.mulf %7, %7 : vector<8x256xf32>
    %cst_1 = arith.constant dense<0.000000e+00> : vector<256xf32>
    %11 = vector.multi_reduction <add>, %10, %cst_1 [0] : vector<8x256xf32> to vector<256xf32>
    %12 = vector.shape_cast %11 : vector<256xf32> to vector<1x256xf32>
    %13 = arith.mulf %9, %9 : vector<8x256xf32>
    %cst_2 = arith.constant dense<0.000000e+00> : vector<256xf32>
    %14 = vector.multi_reduction <add>, %13, %cst_2 [0] : vector<8x256xf32> to vector<256xf32>
    %15 = vector.shape_cast %14 : vector<256xf32> to vector<1x256xf32>
    %16 = arith.addf %0, %12 : vector<1x256xf32>
    %17 = arith.addf %1, %15 : vector<1x256xf32>
    %c1_i32 = arith.constant 1 : i32
    %18 = tpu.iota {dimensions = array<i32: 1>} : vector<1x256xi32>
    %c240_i32_3 = arith.constant 240 : i32
    %19 = vector.broadcast %c240_i32_3 : i32 to vector<1x256xi32>
    %20 = arith.cmpi slt, %18, %19 : vector<1x256xi32>
    %c16_i32 = arith.constant 16 : i32
    %c0_i32_4 = arith.constant 0 : i32
    %21 = arith.cmpi eq, %c16_i32, %c0_i32_4 : i32
    %c1_i32_5 = arith.constant 1 : i32
    %22 = arith.select %21, %c1_i32_5, %c16_i32 : i32
    %23 = vector.broadcast %22 : i32 to vector<1x256xi32>
    %24 = arith.remsi %18, %23 : vector<1x256xi32>
    %c0_i32_6 = arith.constant 0 : i32
    %25 = vector.broadcast %c0_i32_6 : i32 to vector<1x256xi32>
    %26 = arith.cmpi ne, %24, %25 : vector<1x256xi32>
    %c0_i32_7 = arith.constant 0 : i32
    %27 = vector.broadcast %c0_i32_7 : i32 to vector<1x256xi32>
    %28 = arith.cmpi slt, %24, %27 : vector<1x256xi32>
    %c0_i32_8 = arith.constant 0 : i32
    %29 = arith.cmpi slt, %22, %c0_i32_8 : i32
    %30 = vector.broadcast %29 : i1 to vector<1x256xi1>
    %31 = vector.broadcast %30 : vector<1x256xi1> to vector<1x256xi1>
    %32 = arith.xori %28, %31 : vector<1x256xi1>
    %33 = arith.andi %32, %26 : vector<1x256xi1>
    %34 = vector.broadcast %22 : i32 to vector<1x256xi32>
    %35 = arith.addi %24, %34 : vector<1x256xi32>
    %36 = arith.select %33, %35, %24 : vector<1x256xi1>, vector<1x256xi32>
    %c15_i32 = arith.constant 15 : i32
    %37 = vector.broadcast %c15_i32 : i32 to vector<1x256xi32>
    %38 = arith.cmpi ne, %36, %37 : vector<1x256xi32>
    %c256_i32 = arith.constant 256 : i32
    %39 = vector.broadcast %c256_i32 : i32 to vector<1x256xi32>
    %40 = arith.cmpi slt, %18, %39 : vector<1x256xi32>
    %41 = arith.andi %38, %40 : vector<1x256xi1>
    %cst_9 = arith.constant 0.000000e+00 : f32
    %42 = vector.broadcast %cst_9 : f32 to vector<1x256xf32>
    %43 = arith.select %20, %16, %42 : vector<1x256xi1>, vector<1x256xf32>
    %44 = vector.shape_cast %43 : vector<1x256xf32> to vector<1x1x256xf32>
    %cst_10 = arith.constant dense<0.000000e+00> : vector<1xf32>
    %45 = vector.multi_reduction <add>, %44, %cst_10 [1, 2] : vector<1x1x256xf32> to vector<1xf32>
    %46 = vector.shape_cast %45 : vector<1xf32> to vector<1x1x1xf32>
    %47 = vector.extract %46[0, 0, 0] : f32 from vector<1x1x1xf32>
    %cst_11 = arith.constant 0.000000e+00 : f32
    %48 = vector.broadcast %cst_11 : f32 to vector<1x256xf32>
    %49 = arith.select %41, %17, %48 : vector<1x256xi1>, vector<1x256xf32>
    %50 = vector.shape_cast %49 : vector<1x256xf32> to vector<1x1x256xf32>
    %cst_12 = arith.constant dense<0.000000e+00> : vector<1xf32>
    %51 = vector.multi_reduction <add>, %50, %cst_12 [1, 2] : vector<1x1x256xf32> to vector<1xf32>
    %52 = vector.shape_cast %51 : vector<1xf32> to vector<1x1x1xf32>
    %53 = vector.extract %52[0, 0, 0] : f32 from vector<1x1x1xf32>
    %54 = vector.broadcast %47 : f32 to vector<1x1x128xf32>
    %c0_13 = arith.constant 0 : index
    %c0_14 = arith.constant 0 : index
    %c0_15 = arith.constant 0 : index
    %55 = vector.load %arg2[%c0_13, %c0_14, %c0_15] : memref<1x1x128xf32, #tpu.memory_space<vmem>>, vector<1x1x128xf32>
    tpu.vector_store %arg2[%c0_13, %c0_14, %c0_15], %54 {strides = array<i32>} : memref<1x1x128xf32, #tpu.memory_space<vmem>>, vector<1x1x128xf32>,
    %56 = vector.broadcast %53 : f32 to vector<1x1x128xf32>
    %c0_16 = arith.constant 0 : index
    %c0_17 = arith.constant 0 : index
    %c0_18 = arith.constant 0 : index
    %57 = vector.load %arg3[%c0_16, %c0_17, %c0_18] : memref<1x1x128xf32, #tpu.memory_space<vmem>>, vector<1x1x128xf32>
    tpu.vector_store %arg3[%c0_16, %c0_17, %c0_18], %56 {strides = array<i32>} : memref<1x1x128xf32, #tpu.memory_space<vmem>>, vector<1x1x128xf32>,
    return
  }
  func.func @transform_0(%arg0: i32) -> (i32, i32) {
    %c0_i32 = arith.constant 0 : i32
    %c0_i32_0 = arith.constant 0 : i32
    return %arg0, %c0_i32 : i32, i32
  }
  func.func @transform_1(%arg0: i32) -> (i32, i32, i32) {
    %c0_i32 = arith.constant 0 : i32
    %c0_i32_0 = arith.constant 0 : i32
    %c0_i32_1 = arith.constant 0 : i32
    return %arg0, %c0_i32, %c0_i32_0 : i32, i32, i32
  }
  func.func @transform_2(%arg0: i32) -> (i32, i32, i32) {
    %c0_i32 = arith.constant 0 : i32
    %c0_i32_0 = arith.constant 0 : i32
    %c0_i32_1 = arith.constant 0 : i32
    return %arg0, %c0_i32, %c0_i32_0 : i32, i32, i32
  }
}

</mosaic_0001>

<bundles_post_ra>
// kernel: tpu_custom_call.1
= control target key start
LH: loop header
LB: loop body
LE: loop exit
PB: predicated region body
PF: predicated region fallthrough
CT: control target
= control target key end

     0   :  { %8 = vsyncpa [#allocation3], 0  ;;  %s280_s0 = inlined_call_operand.hbm [shape: f32[8,256], index: 0, kind: input, shape index: {}]   ;;  %s281_s1 = inlined_call_operand.hbm [shape: f32[1,1,128], index: 1, kind: output, shape index: {0}]   ;;  %s282_s2 = inlined_call_operand.hbm [shape: f32[1,1,128], index: 2, kind: output, shape index: {1}]  }
   0x1   :  { %9 = vsyncpa [#allocation4], 0 }
   0x2   :  { %10 = vsyncpa [#allocation7], 0  ;;  %s251_s9 = smov [#allocation2]  }
   0x3   :  { %s17_s10 = sshll.u32 %s251_s9, 4  ;;  %s18_s10 = int_to_ptr.vmem [resolvable:$true] %s17_s10 }
   0x4   :  { %s193_s11 = scalar_lea.vmem %s18_s10, 256  ;;  %p198_p1 = scmp.lt.s32.totalorder %s18_s10, %s18_s10 }
   0x5   :  { %p194_p0 = scmp.ne.s32.totalorder %s18_s10, %s193_s11  ;;  %p199_p2 = scmp.lt.s32.totalorder %s193_s11, %s193_s11 }
   0x7   :  { %p200_p3 = por %p199_p2, %p198_p1 }
   0x9   :  { %p201_p4 = pnand %p200_p3, %p194_p0 }
   0xb   :  { %204 = shalt.err (!%p201_p4)
}
   0xc   :  { %20 = dma.hbm_to_vmem [thread:$0]  %s280_s0, 256, %s18_s10, [#allocation3]  }
   0xd   :  { %245 = dma.done.wait [#allocation3], 256  }
   0xe   :  { %246 = vsyncadd [#allocation3], 4294967040  ;;  %v27_v0 = vld [vmem:[#allocation2] sm:$0xff]  ;;  %s252_s14 = smov 127   ;;  %s253_s15 = smov 112   ;;  %v28_v1 = vld [vmem:[#allocation2 + $0x8] sm:$0xff]  ;;  %v33_v2 = vlaneseq }
   0xf   :  { %40 = vrot.lane.b32.xlu1 %v27_v0, %s252_s14  ;;  %29 = vrot.lane.b32.xlu0 %v27_v0, %s253_s15  ;;  %vm116_vm4 = vcmask 1040384   ;;  %s254_s0 = smov [#allocation5]   ;;  %s255_s17 = smov [#allocation6]  }
  0x10   :  { %v34_v3 = vand.u32 127, %v33_v2  ;;  %s153_s16 = sshll.u32 %s254_s0, 4  ;;  %s163_s18 = sshll.u32 %s255_s17, 4  ;;  %s154_s16 = int_to_ptr.vmem [resolvable:$true] %s153_s16  ;;  %s164_s18 = int_to_ptr.vmem [resolvable:$true] %s163_s18 }
  0x11   :  { %s205_s21 = scalar_lea.vmem %s154_s16, 16  ;;  %s209_s22 = scalar_lea.vmem %s154_s16, 32 }
  0x12   :  { %vm44_vm0 = vcmp.lt.s32.totalorder %v34_v3, 127  ;;  %vm35_vm1 = vcmp.lt.s32.totalorder %v34_v3, 112  ;;  %v81_v24 = vadd.s32 128, %v34_v3  ;;  %v88_v33 = vand.u32 15, %v34_v3  ;;  %p206_p5 = scmp.ne.s32.totalorder %s154_s16, %s205_s21  ;;  %p210_p6 = scmp.lt.s32.totalorder %s154_s16, %s154_s16 }
  0x13   :  { %42 = vrot.lane.b32.xlu1 %v28_v1, %s252_s14  ;;  %31 = vrot.lane.b32.xlu0 %v28_v1, %s253_s15  ;;  %p211_p7 = scmp.lt.s32.totalorder %s209_s22, %s205_s21 }
  0x14   :  { %v95_v34 = vand.u32 15, %v81_v24  ;;  %vm108_vm2 = vcmp.ne.s32.totalorder %v88_v33, 15  ;;  %vm83_vm5 = vcmp.lt.s32.totalorder %v81_v24, 240 }
  0x15   :  { %p212_p8 = por %p211_p7, %p210_p6 }
  0x16   :  { %vm109_vm3 = vcmp.ne.s32.totalorder %v95_v34, 15 }
  0x17   :  { %p213_p9 = pnand %p212_p8, %p206_p5 }
  0x81   :  { %v41_v4 = vpop.permute.xlu1 %40  ;;  %v30_v5 = vpop.permute.xlu0 %29 }
  0x85   :  { %v43_v6 = vpop.permute.xlu1 %42  ;;  %v32_v7 = vpop.permute.xlu0 %31 }
  0x86   :  { %v45_v8 = vsel %vm44_vm0, %v41_v4, %v43_v6  ;;  %v46_v9 = vsel %vm44_vm0, %v43_v6, %v41_v4  ;;  %v36_v10 = vsel %vm35_vm1, %v30_v5, %v32_v7  ;;  %v37_v11 = vsel %vm35_vm1, %v32_v7, %v30_v5 }
  0x87   :  { %v47_v12 = vsub.f32 %v45_v8, %v27_v0  ;;  %v48_v13 = vsub.f32 %v46_v9, %v28_v1  ;;  %v38_v14 = vsub.f32 %v36_v10, %v27_v0  ;;  %v39_v15 = vsub.f32 %v37_v11, %v28_v1 }
  0x89   :  { %v63_v16 = vmul.f32 %v47_v12, %v47_v12  ;;  %v64_v17 = vmul.f32 %v48_v13, %v48_v13  ;;  %v49_v18 = vmul.f32 %v38_v14, %v38_v14  ;;  %v50_v19 = vmul.f32 %v39_v15, %v39_v15 }
  0x8b   :  { %v65_v20 = vrot.slane %v63_v16, 4  ;;  %v71_v21 = vrot.slane %v64_v17, 4  ;;  %v51_v22 = vrot.slane %v49_v18, 4  ;;  %v57_v23 = vrot.slane %v50_v19, 4 }
  0x8d   :  { %v66_v25 = vadd.f32 %v65_v20, %v63_v16  ;;  %v72_v26 = vadd.f32 %v71_v21, %v64_v17  ;;  %v52_v27 = vadd.f32 %v51_v22, %v49_v18  ;;  %v58_v28 = vadd.f32 %v57_v23, %v50_v19 }
  0x8f   :  { %v67_v29 = vrot.slane %v66_v25, 2  ;;  %v73_v30 = vrot.slane %v72_v26, 2  ;;  %v53_v31 = vrot.slane %v52_v27, 2  ;;  %v59_v32 = vrot.slane %v58_v28, 2 }
  0x91   :  { %v68_v35 = vadd.f32 %v67_v29, %v66_v25  ;;  %v74_v36 = vadd.f32 %v73_v30, %v72_v26  ;;  %v60_v37 = vadd.f32 %v59_v32, %v58_v28  ;;  %v54_v38 = vadd.f32 %v53_v31, %v52_v27 }
  0x93   :  { %v69_v39 = vrot.slane %v68_v35, 1  ;;  %v75_v40 = vrot.slane %v74_v36, 1  ;;  %v55_v41 = vrot.slane %v54_v38, 1  ;;  %v61_v42 = vrot.slane %v60_v37, 1 }
  0x95   :  { %v70_v43 = vadd.f32 %v69_v39, %v68_v35  ;;  %v76_v44 = vadd.f32 %v75_v40, %v74_v36  ;;  %v56_v45 = vadd.f32 %v55_v41, %v54_v38  ;;  %v62_v46 = vadd.f32 %v61_v42, %v60_v37 }
  0x97   :  { %v129_v47 = vsel %vm108_vm2, %v70_v43, 0.0  ;;  %v130_v48 = vsel %vm109_vm3, %v76_v44, 0.0  ;;  %v115_v49 = vsel %vm83_vm5, %v62_v46, 0.0  ;;  %v117_v50 = vsel %vm116_vm4, %v56_v45, 0.0 }
  0x98   :  { %v131_v51 = vsel %vm116_vm4, %v129_v47, 0.0  ;;  %v132_v52 = vsel %vm116_vm4, %v130_v48, 0.0  ;;  %v118_v53 = vsel %vm116_vm4, %v115_v49, 0.0 }
  0x99   :  { %v133_v54 = vadd.f32 %v132_v52, %v131_v51  ;;  %v119_v55 = vadd.f32 %v118_v53, %v117_v50 }
  0x9b   :  { %134 = vadd.xlane.f32.xlu1 %v133_v54  ;;  %120 = vadd.xlane.f32.xlu0 %v119_v55 }
 0x124   :  { %v135_v56 = vpop.xlane.xlu1 %134  ;;  %v121_v57 = vpop.xlane.xlu0 %120 }
 0x125   :  { %v136_v58 = vrot.slane %v135_v56, 4  ;;  %v122_v59 = vrot.slane %v121_v57, 4 }
 0x127   :  { %v137_v60 = vadd.f32 %v136_v58, %v135_v56  ;;  %v123_v61 = vadd.f32 %v122_v59, %v121_v57 }
 0x129   :  { %v138_v62 = vrot.slane %v137_v60, 2  ;;  %v124_v63 = vrot.slane %v123_v61, 2 }
 0x12b   :  { %v139_v0 = vadd.f32 %v138_v62, %v137_v60  ;;  %v125_v1 = vadd.f32 %v124_v63, %v123_v61 }
 0x12d   :  { %v126_v2 = vrot.slane %v125_v1, 1  ;;  %v140_v3 = vrot.slane %v139_v0, 1 }
 0x12f   :  { %v127_v4 = vadd.f32 %v126_v2, %v125_v1  ;;  %v141_v5 = vadd.f32 %v140_v3, %v139_v0 }
 0x131   :  { %176 = vpush %v127_v4 }
 0x132   :  { %178 = vpush %v141_v5 }
 0x162   :  { %s177_s19 = spop %176 }
 0x163   :  { %v143_v6 = vstv %s177_s19  ;;  %s179_s20 = spop %178 }
 0x164   :  { %144 = vst [vmem:[#allocation5] sm:$0x1] %v143_v6  ;;  %v145_v7 = vstv %s179_s20 }
 0x165   :  { %146 = vst [vmem:[#allocation6] sm:$0x1] %v145_v7 }
 0x166   :  { %216 = shalt.err (!%p213_p9)
}
 0x167   :  { %156 = dma.vmem_to_hbm [thread:$0]  %s154_s16, 16, %s281_s1, [#allocation4]  }
 0x168   :  { %s225_s25 = scalar_lea.vmem %s164_s18, 16  ;;  %s229_s26 = scalar_lea.vmem %s164_s18, 32 }
 0x169   :  { %p226_p10 = scmp.ne.s32.totalorder %s164_s18, %s225_s25  ;;  %p230_p11 = scmp.lt.s32.totalorder %s164_s18, %s164_s18 }
 0x16a   :  { %p231_p12 = scmp.lt.s32.totalorder %s229_s26, %s225_s25 }
 0x16c   :  { %p232_p13 = por %p231_p12, %p230_p11 }
 0x16e   :  { %p233_p0 = pnand %p232_p13, %p226_p10 }
 0x170   :  { %236 = shalt.err (!%p233_p0)
}
 0x171   :  { %166 = dma.vmem_to_hbm [thread:$0]  %s164_s18, 16, %s282_s2, [#allocation7]  }
 0x172   :  { %247 = dma.done.wait [#allocation4], 16  }
 0x173   :  { %248 = vsyncadd [#allocation4], 4294967280 }
 0x174   :  { %249 = dma.done.wait [#allocation7], 16  }
 0x175   :  { %250 = vsyncadd [#allocation7], 4294967280 }
 0x176   :  { %173 = vsyncpa [#allocation3], 1 }
 0x177   :  { %174 = vsyncpa [#allocation4], 1 }
 0x178   :  { %175 = vsyncpa [#allocation7], 1 }

</bundles_post_ra>
